<compile_context>
chip_gen: v5e
topology: v5e:2x2
jax: 0.10.0
libtpu: 0.0.40
codegen_flags: <defaults>
</compile_context>

<pallas_src>
import functools

import jax
import jax.numpy as jnp
from jax import lax
from jax.experimental import pallas as pl
from jax.experimental.pallas import tpu as pltpu

EPS = 1e-5       # BatchNorm2d default eps
CONV_CH = 320    # Conv2d output channels fixed by the module


def _pick_tile(n, cap, mult=8):
    """Largest multiple-of-`mult` divisor of n that is <= cap, else n.

    Full-dim blocks are always legal layout-wise; the fallback only costs VMEM
    for very large, awkwardly sized batches.
    """
    if n <= cap:
        return n
    t = (cap // mult) * mult
    while t >= mult:
        if n % t == 0:
            return t
        t -= mult
    # TODO(synk): pad the row/batch axis instead of using a full-axis block
    # when n is huge and has no multiple-of-8 divisor <= cap.
    return n


def _conv_stats_kernel(patches_ref, wconv_ref, conv_ref, sum_ref, ssq_ref):
    """Pass 1: conv-as-im2col-matmul + per-channel sum / sum-of-squares."""
    # Conv bias intentionally omitted: it cancels under training-mode BN.
    conv = jnp.dot(patches_ref[...], wconv_ref[...],
                   preferred_element_type=jnp.float32)            # (TM, 320) f32

    @pl.when(pl.program_id(0) == 0)
    def _():
        sum_ref[...] = jnp.zeros_like(sum_ref)
        ssq_ref[...] = jnp.zeros_like(ssq_ref)

    # Stats accumulated in f32 from the f32 MXU result (before the bf16 store).
    sum_ref[...] += jnp.sum(conv, axis=0, keepdims=True)          # (1, 320)
    ssq_ref[...] += jnp.sum(conv * conv, axis=0, keepdims=True)   # (1, 320)

    conv_ref[...] = conv.astype(conv_ref.dtype)                   # bf16 to HBM


def _bn_pool_fc_kernel(P, inv_n,
                       conv_ref, sum_ref, ssq_ref, gamma_ref, beta_ref,
                       w1_ref, b1_ref, w2_ref, b2_ref, out_ref):
    """Pass 2: folded BN + maxpool + ReLU + fc1 + ReLU + fc2 + sigmoid."""
    # Fold training-mode BatchNorm (biased variance) into one scale/offset.
    mean = sum_ref[...] * inv_n                                    # (1, 320)
    var = jnp.maximum(ssq_ref[...] * inv_n - mean * mean, 0.0)     # (1, 320)
    scale = gamma_ref[...] * lax.rsqrt(var + EPS)
    offset = beta_ref[...] - mean * scale

    # MaxPool2d(2) over the 2x2 conv map == max over the P spatial positions.
    # conv_ref is (P, TB, 320) p-major, so this is P-1 vectorized VPU maximums.
    # ReLU is monotone -> apply it once after the max (saves P-1 relu passes).
    m = conv_ref[0].astype(jnp.float32) * scale + offset           # (TB, 320)
    for p in range(1, P):
        m = jnp.maximum(m, conv_ref[p].astype(jnp.float32) * scale + offset)
    pooled = jnp.maximum(m, 0.0)                                   # (TB, 320)

    # fc1 on the MXU (bf16 inputs, f32 accumulation) + ReLU.
    h = jnp.dot(pooled.astype(jnp.bfloat16), w1_ref[...],
                preferred_element_type=jnp.float32) + b1_ref[...]
    h = jnp.maximum(h, 0.0)                                        # (TB, hidden)

    # fc2 has a single output column -> VPU broadcast-mul + XLU lane reduce.
    logits = jnp.sum(h * w2_ref[...], axis=-1, keepdims=True) + b2_ref[...]
    out_ref[...] = jax.nn.sigmoid(logits)                          # (TB, 1)


def prepare_params(params):
    """One-time parameter prep, hoisted out of the forward path."""
    C = params["conv_w"].shape[1]
    return {
        # (C*9, 320) bf16 for the MXU; conv bias deliberately not carried.
        "wconv": params["conv_w"].reshape(CONV_CH, C * 9).T.astype(jnp.bfloat16),
        "gamma": params["bn_gamma"].reshape(1, CONV_CH).astype(jnp.float32),
        "beta": params["bn_beta"].reshape(1, CONV_CH).astype(jnp.float32),
        "w1": params["fc1_w"].T.astype(jnp.bfloat16),              # (320, hidden)
        "b1": params["fc1_b"].reshape(1, -1).astype(jnp.float32),  # (1, hidden)
        "w2": params["fc2_w"].reshape(1, -1).astype(jnp.float32),  # (1, hidden)
        "b2": params["fc2_b"].reshape(1, 1).astype(jnp.float32),   # (1, 1)
    }


def relation_network_forward(x, prep):
    """x: (B, C, H, W) NCHW float32 -> (B, 1) float32 (matches the module)."""
    B, C, H, W = x.shape
    OH, OW = H - 2, W - 2
    # fc1 = Linear(320, hidden) forces a 1x1 map after MaxPool2d(2); only a
    # 2x2 conv output (4x4 input) is faithful to the PyTorch module.
    assert OH == 2 and OW == 2, "input spatial must be 4x4 for this module"
    P = OH * OW
    ROWS = B * P
    hidden = prep["w1"].shape[1]

    # --- im2col glue (plain JAX), p-major rows: row = p*B + b --------------
    # TODO(synk): for large H,W move the conv into pass 1 as 9 accumulated
    # matmuls over shifted views of x to avoid materializing the patch matrix.
    cols = jnp.stack([x[:, :, kh:kh + OH, kw:kw + OW]
                      for kh in range(3) for kw in range(3)], axis=-1)  # (B,C,OH,OW,9)
    patches = (cols.transpose(2, 3, 0, 1, 4)
               .reshape(ROWS, C * 9)
               .astype(jnp.bfloat16))                                   # (P*B, C*9)

    # --- pass 1: conv + BN statistics (row-tiled, reduction axis) ----------
    TM = _pick_tile(ROWS, 512)    # <=512 rows keeps pipelining inside v7x VMEM
    conv, ssum, ssq = pl.pallas_call(
        _conv_stats_kernel,
        out_shape=(jax.ShapeDtypeStruct((ROWS, CONV_CH), jnp.bfloat16),
                   jax.ShapeDtypeStruct((1, CONV_CH), jnp.float32),
                   jax.ShapeDtypeStruct((1, CONV_CH), jnp.float32)),
        grid=(ROWS // TM,),
        in_specs=[pl.BlockSpec((TM, C * 9), lambda i: (i, 0)),
                  pl.BlockSpec((C * 9, CONV_CH), lambda i: (0, 0))],
        out_specs=(pl.BlockSpec((TM, CONV_CH), lambda i: (i, 0)),
                   pl.BlockSpec((1, CONV_CH), lambda i: (0, 0)),
                   pl.BlockSpec((1, CONV_CH), lambda i: (0, 0))),
        compiler_params=pltpu.CompilerParams(
            dimension_semantics=("arbitrary",)),
    )(patches, prep["wconv"])

    # p-major rows -> free reshape to (P, B, 320) for vectorized pooling.
    conv3 = conv.reshape(P, B, CONV_CH)

    # --- pass 2: BN + pool + ReLU + fc1 + fc2 + sigmoid (batch-parallel) ---
    TB = _pick_tile(B, 256)
    kernel2 = functools.partial(_bn_pool_fc_kernel, P, 1.0 / float(ROWS))
    out = pl.pallas_call(
        kernel2,
        out_shape=jax.ShapeDtypeStruct((B, 1), jnp.float32),
        grid=(B // TB,),
        in_specs=[pl.BlockSpec((P, TB, CONV_CH), lambda j: (0, j, 0)),  # conv3
                  pl.BlockSpec((1, CONV_CH), lambda j: (0, 0)),         # sum
                  pl.BlockSpec((1, CONV_CH), lambda j: (0, 0)),         # sumsq
                  pl.BlockSpec((1, CONV_CH), lambda j: (0, 0)),         # gamma
                  pl.BlockSpec((1, CONV_CH), lambda j: (0, 0)),         # beta
                  pl.BlockSpec((CONV_CH, hidden), lambda j: (0, 0)),    # w1
                  pl.BlockSpec((1, hidden), lambda j: (0, 0)),          # b1
                  pl.BlockSpec((1, hidden), lambda j: (0, 0)),          # w2
                  pl.BlockSpec((1, 1), lambda j: (0, 0))],              # b2
        out_specs=pl.BlockSpec((TB, 1), lambda j: (j, 0)),
        compiler_params=pltpu.CompilerParams(
            dimension_semantics=("parallel",)),
    )(conv3, ssum, ssq, prep["gamma"], prep["beta"],
      prep["w1"], prep["b1"], prep["w2"], prep["b2"])
    return out


def reference_forward(x, params):
    """Pure-JAX f32 reference of the PyTorch forward (training-mode BatchNorm)."""
    conv = lax.conv_general_dilated(x, params["conv_w"], (1, 1), "VALID",
                                    dimension_numbers=("NCHW", "OIHW", "NCHW"))
    conv = conv + params["conv_b"][None, :, None, None]
    mean = jnp.mean(conv, axis=(0, 2, 3), keepdims=True)
    var = jnp.mean((conv - mean) ** 2, axis=(0, 2, 3), keepdims=True)
    y = (conv - mean) / jnp.sqrt(var + EPS)
    y = y * params["bn_gamma"][None, :, None, None] + params["bn_beta"][None, :, None, None]
    y = jnp.maximum(y, 0.0)
    y = lax.reduce_window(y, -jnp.inf, lax.max, (1, 1, 2, 2), (1, 1, 2, 2), "VALID")
    flat = y.reshape(x.shape[0], -1)
    h = jnp.maximum(flat @ params["fc1_w"].T + params["fc1_b"], 0.0)
    return jax.nn.sigmoid(h @ params["fc2_w"].T + params["fc2_b"])


def init_params(key, input_size, hidden_size):
    ks = jax.random.split(key, 8)
    return {
        "conv_w": 0.1 * jax.random.normal(ks[0], (CONV_CH, input_size, 3, 3), jnp.float32),
        "conv_b": 0.1 * jax.random.normal(ks[1], (CONV_CH,), jnp.float32),
        "bn_gamma": 1.0 + 0.1 * jax.random.normal(ks[2], (CONV_CH,), jnp.float32),
        "bn_beta": 0.1 * jax.random.normal(ks[3], (CONV_CH,), jnp.float32),
        "fc1_w": 0.1 * jax.random.normal(ks[4], (hidden_size, CONV_CH), jnp.float32),
        "fc1_b": 0.1 * jax.random.normal(ks[5], (hidden_size,), jnp.float32),
        "fc2_w": 0.1 * jax.random.normal(ks[6], (1, hidden_size), jnp.float32),
        "fc2_b": 0.1 * jax.random.normal(ks[7], (1,), jnp.float32),
    }


if __name__ == "__main__":
    # fc1 = Linear(320, hidden) forces a 1x1 spatial map after conv+pool,
    # so the module implies a 4x4 input.
    B, C, H, W = 2, 4, 4, 4
    HIDDEN = 32

    key = jax.random.PRNGKey(0)
    kx, kp = jax.random.split(key)
    x = jax.random.normal(kx, (B, C, H, W), jnp.float32)
    params = init_params(kp, C, HIDDEN)
    prep = prepare_params(params)

    out = jax.block_until_ready(relation_network_forward(x, prep))
    ref = jax.block_until_ready(reference_forward(x, params))

    assert out.shape == (B, 1)
    # Reference is full f32 (and includes the conv bias, which cancels under
    # training-mode BN); kernel uses bf16 MXU inputs / bf16 conv intermediate
    # with f32 accumulation & stats, hence the slightly loosened tolerance.
    assert jnp.allclose(out, ref, atol=2e-2, rtol=2e-2), (out, ref)

    print("KERNEL_OK")
</pallas_src>

<mosaic_0001>
module attributes {stable_mosaic.version = 11 : i64} {
  func.func @_conv_stats_kernel(%arg0: i32, %arg1: memref<8x36xbf16, #tpu.memory_space<vmem>>, %arg2: memref<36x320xbf16, #tpu.memory_space<vmem>>, %arg3: memref<8x320xbf16, #tpu.memory_space<vmem>>, %arg4: memref<1x320xf32, #tpu.memory_space<vmem>>, %arg5: memref<1x320xf32, #tpu.memory_space<vmem>>) attributes {dimension_semantics = [#tpu.dimension_semantics<arbitrary>], iteration_bounds = array<i64: 1>, scalar_prefetch = 0 : i64, scratch_operands = 0 : i64, tpu.core_type = #tpu.core_type<tc>, window_params = [{transform_indices = @transform_0, window_bounds = array<i64: 8, 36>}, {pipeline_mode = #tpu.pipeline_mode<synchronous>, transform_indices = @transform_1, window_bounds = array<i64: 36, 320>}, {transform_indices = @transform_2, window_bounds = array<i64: 8, 320>}, {pipeline_mode = #tpu.pipeline_mode<synchronous>, transform_indices = @transform_3, window_bounds = array<i64: 1, 320>}, {pipeline_mode = #tpu.pipeline_mode<synchronous>, transform_indices = @transform_4, window_bounds = array<i64: 1, 320>}]} {
    %c0 = arith.constant 0 : index
    %c0_0 = arith.constant 0 : index
    %0 = vector.load %arg1[%c0, %c0_0] : memref<8x36xbf16, #tpu.memory_space<vmem>>, vector<8x36xbf16>
    %c0_1 = arith.constant 0 : index
    %c0_2 = arith.constant 0 : index
    %1 = vector.load %arg2[%c0_1, %c0_2] : memref<36x320xbf16, #tpu.memory_space<vmem>>, vector<36x320xbf16>
    %cst = arith.constant dense<0.000000e+00> : vector<8x320xf32>
    %2 = tpu.matmul %0, %1, %cst {dimension_numbers = #tpu.dot_dimension_numbers<[1], [0], [0], [1], [0, 0, 1, 1], [], []>} : vector<8x36xbf16>, vector<36x320xbf16>, vector<8x320xf32> -> vector<8x320xf32>
    %c0_i32 = arith.constant 0 : i32
    %3 = arith.cmpi eq, %arg0, %c0_i32 : i32
    %4 = arith.extui %3 : i1 to i32
    %c0_i32_3 = arith.constant 0 : i32
    %5 = arith.cmpi ne, %4, %c0_i32_3 : i32
    scf.if %5 {
      %cst_16 = arith.constant 0.000000e+00 : f32
      %19 = vector.broadcast %cst_16 : f32 to vector<1x320xf32>
      %c0_17 = arith.constant 0 : index
      %c0_18 = arith.constant 0 : index
      %20 = vector.load %arg4[%c0_17, %c0_18] : memref<1x320xf32, #tpu.memory_space<vmem>>, vector<1x320xf32>
      tpu.vector_store %arg4[%c0_17, %c0_18], %19 {strides = array<i32>} : memref<1x320xf32, #tpu.memory_space<vmem>>, vector<1x320xf32>,
      %cst_19 = arith.constant 0.000000e+00 : f32
      %21 = vector.broadcast %cst_19 : f32 to vector<1x320xf32>
      %c0_20 = arith.constant 0 : index
      %c0_21 = arith.constant 0 : index
      %22 = vector.load %arg5[%c0_20, %c0_21] : memref<1x320xf32, #tpu.memory_space<vmem>>, vector<1x320xf32>
      tpu.vector_store %arg5[%c0_20, %c0_21], %21 {strides = array<i32>} : memref<1x320xf32, #tpu.memory_space<vmem>>, vector<1x320xf32>,
    } else {
    }
    %c0_4 = arith.constant 0 : index
    %c0_5 = arith.constant 0 : index
    %6 = vector.load %arg4[%c0_4, %c0_5] : memref<1x320xf32, #tpu.memory_space<vmem>>, vector<1x320xf32>
    %cst_6 = arith.constant dense<0.000000e+00> : vector<320xf32>
    %7 = vector.multi_reduction <add>, %2, %cst_6 [0] : vector<8x320xf32> to vector<320xf32>
    %8 = vector.shape_cast %7 : vector<320xf32> to vector<1x320xf32>
    %9 = arith.addf %6, %8 : vector<1x320xf32>
    %c0_7 = arith.constant 0 : index
    %c0_8 = arith.constant 0 : index
    %10 = vector.load %arg4[%c0_7, %c0_8] : memref<1x320xf32, #tpu.memory_space<vmem>>, vector<1x320xf32>
    tpu.vector_store %arg4[%c0_7, %c0_8], %9 {strides = array<i32>} : memref<1x320xf32, #tpu.memory_space<vmem>>, vector<1x320xf32>,
    %c0_9 = arith.constant 0 : index
    %c0_10 = arith.constant 0 : index
    %11 = vector.load %arg5[%c0_9, %c0_10] : memref<1x320xf32, #tpu.memory_space<vmem>>, vector<1x320xf32>
    %12 = arith.mulf %2, %2 : vector<8x320xf32>
    %cst_11 = arith.constant dense<0.000000e+00> : vector<320xf32>
    %13 = vector.multi_reduction <add>, %12, %cst_11 [0] : vector<8x320xf32> to vector<320xf32>
    %14 = vector.shape_cast %13 : vector<320xf32> to vector<1x320xf32>
    %15 = arith.addf %11, %14 : vector<1x320xf32>
    %c0_12 = arith.constant 0 : index
    %c0_13 = arith.constant 0 : index
    %16 = vector.load %arg5[%c0_12, %c0_13] : memref<1x320xf32, #tpu.memory_space<vmem>>, vector<1x320xf32>
    tpu.vector_store %arg5[%c0_12, %c0_13], %15 {strides = array<i32>} : memref<1x320xf32, #tpu.memory_space<vmem>>, vector<1x320xf32>,
    %17 = arith.truncf %2 : vector<8x320xf32> to vector<8x320xbf16>
    %c0_14 = arith.constant 0 : index
    %c0_15 = arith.constant 0 : index
    %18 = vector.load %arg3[%c0_14, %c0_15] : memref<8x320xbf16, #tpu.memory_space<vmem>>, vector<8x320xbf16>
    tpu.vector_store %arg3[%c0_14, %c0_15], %17 {strides = array<i32>} : memref<8x320xbf16, #tpu.memory_space<vmem>>, vector<8x320xbf16>,
    return
  }
  func.func @transform_0(%arg0: i32) -> (i32, i32) {
    %c0_i32 = arith.constant 0 : i32
    %c0_i32_0 = arith.constant 0 : i32
    return %arg0, %c0_i32 : i32, i32
  }
  func.func @transform_1(%arg0: i32) -> (i32, i32) {
    %c0_i32 = arith.constant 0 : i32
    %c0_i32_0 = arith.constant 0 : i32
    %c0_i32_1 = arith.constant 0 : i32
    return %c0_i32, %c0_i32_0 : i32, i32
  }
  func.func @transform_2(%arg0: i32) -> (i32, i32) {
    %c0_i32 = arith.constant 0 : i32
    %c0_i32_0 = arith.constant 0 : i32
    return %arg0, %c0_i32 : i32, i32
  }
  func.func @transform_3(%arg0: i32) -> (i32, i32) {
    %c0_i32 = arith.constant 0 : i32
    %c0_i32_0 = arith.constant 0 : i32
    %c0_i32_1 = arith.constant 0 : i32
    return %c0_i32, %c0_i32_0 : i32, i32
  }
  func.func @transform_4(%arg0: i32) -> (i32, i32) {
    %c0_i32 = arith.constant 0 : i32
    %c0_i32_0 = arith.constant 0 : i32
    %c0_i32_1 = arith.constant 0 : i32
    return %c0_i32, %c0_i32_0 : i32, i32
  }
}

</mosaic_0001>

<bundles_post_ra>
// kernel: tpu_custom_call.1
= control target key start
LH: loop header
LB: loop body
LE: loop exit
PB: predicated region body
PF: predicated region fallthrough
CT: control target
= control target key end

     0   :  { %10 = vsyncpa [#allocation3], 0  ;;  %s522_s0 = inlined_call_operand.hbm [shape: bf16[8,36], index: 0, kind: input, shape index: {}]   ;;  %s523_s1 = inlined_call_operand.hbm [shape: bf16[36,320], index: 1, kind: input, shape index: {}]   ;;  %s524_s2 = inlined_call_operand.hbm [shape: bf16[8,320], index: 2, kind: output, shape index: {0}]   ;;  %s525_s3 = inlined_call_operand.hbm [shape: f32[1,320], index: 3, kind: output, shape index: {1}]   ;;  %s526_s4 = inlined_call_operand.hbm [shape: f32[1,320], index: 4, kind: output, shape index: {2}]  }
   0x1   :  { %11 = vsyncpa [#allocation6], 0 }
   0x2   :  { %12 = vsyncpa [#allocation4], 0 }
   0x3   :  { %13 = vsyncpa [#allocation9], 0  ;;  %s19_s17 = sshll.u32 %s522_s0, 4  ;;  %s453_s18 = smov [#allocation2]   ;;  %s20_s17 = int_to_ptr.hbm [resolvable:$true] %s19_s17 }
   0x4   :  { %s21_s19 = sshll.u32 %s453_s18, 4  ;;  %s29_s22 = sshll.u32 %s523_s1, 4  ;;  %s22_s19 = int_to_ptr.vmem [resolvable:$true] %s21_s19  ;;  %s30_s22 = int_to_ptr.hbm [resolvable:$true] %s29_s22 }
   0x5   :  { %24 = dma.hbm_to_vmem [thread:$0]  %s20_s17, 64, %s22_s19, [#allocation3]  }
   0x6   :  { %s454_s23 = smov [#allocation5]   ;;  %s455_s25 = smov 192  }
   0x7   :  { %s31_s24 = sshll.u32 %s454_s23, 4  ;;  %s456_s26 = smov 12   ;;  %s32_s24 = int_to_ptr.vmem [resolvable:$true] %s31_s24 }
   0x8   :  { %37 = dma.hbm_to_vmem [thread:$0]  %s30_s22, 960, %s32_s24, [#allocation6], %s455_s25, %s455_s25, %s456_s26  }
   0x9   :  { %445 = dma.done.wait [#allocation3], 64  }
   0xa   :  { %446 = vsyncadd [#allocation3], 4294967232 }
   0xb   :  { %447 = dma.done.wait [#allocation6], 960  }
   0xc   :  { %448 = vsyncadd [#allocation6], 4294966336  ;;  %v56_v0 = vld [vmem:[#allocation5 + $0x30] sm:$0x33]  ;;  %v57_v1 = vld [vmem:[#allocation5 + $0x38] sm:$0x3]  ;;  %v155_v30 = vlaneseq }
   0xd   :  { %v80_v2 = vunpack.c.l.b16 %v56_v0  ;;  %v81_v3 = vunpack.c.h.b16 %v56_v0  ;;  %v82_v4 = vunpack.c.l.b16 %v57_v1  ;;  %vm102_vm0 = vcmask 1041408   ;;  %v298_v5 = vld [vmem:[#allocation5 + $0x18] sm:$0xf]  ;;  %v315_v9 = vld [vmem:[#allocation5 + $0x20] sm:$0xf0]  ;;  %s458_s0 = smov [#allocation7]  }
   0xe   :  { %v314_v10 = vld [vmem:[#allocation5 + $0x1c] sm:$0xf]  ;;  %v300_v11 = vld [vmem:[#allocation5 + $0x24] sm:$0xf0]  ;;  %v306_v12 = vld [vmem:[#allocation5 + $0x20] sm:$0xf]  ;;  %v299_v17 = vor.u32 %v315_v9, %v298_v5 }
   0xf   :  { %v89_v6 = vpack.c.b16 %v80_v2, %v80_v2  ;;  %v90_v7 = vpack.c.b16 %v81_v3, %v81_v3  ;;  %v91_v8 = vpack.c.b16 %v82_v4, %v82_v4  ;;  %v316_v13 = vld [vmem:[#allocation5 + $0x28] sm:$0xf0]  ;;  %v303_v18 = vor.u32 %v314_v10, %v300_v11  ;;  %v286_v19 = vld [vmem:[#allocation5] sm:$0xf]  ;;  %v311_v22 = vld [vmem:[#allocation5 + $0x4] sm:$0xf] }
  0x10   :  { %v307_v20 = vor.u32 %v316_v13, %v306_v12  ;;  %v312_v21 = vld [vmem:[#allocation5 + $0x8] sm:$0xf0]  ;;  %v288_v23 = vld [vmem:[#allocation5 + $0xc] sm:$0xf0]  ;;  %v294_v24 = vld [vmem:[#allocation5 + $0x8] sm:$0xf] }
  0x11   :  { %v104_v14 = vsel %vm102_vm0, %v89_v6, 0  ;;  %v107_v15 = vsel %vm102_vm0, %v90_v7, 0  ;;  %v110_v16 = vsel %vm102_vm0, %v91_v8, 0  ;;  %v313_v25 = vld [vmem:[#allocation5 + $0x10] sm:$0xf0]  ;;  %v287_v26 = vor.u32 %v312_v21, %v286_v19  ;;  %s240_s1 = sshll.u32 %s458_s0, 4  ;;  %s241_s1 = int_to_ptr.vmem [resolvable:$true] %s240_s1 }
  0x12   :  { %117 = vmatpush.bf16.msra.mxu0 %v104_v14  ;;  %130 = vmatpush.bf16.msra.mxu1 %v107_v15  ;;  %v291_v27 = vor.u32 %v311_v22, %v288_v23  ;;  %v295_v28 = vor.u32 %v313_v25, %v294_v24  ;;  %v47_v29 = vld [vmem:[#allocation2] sm:$0xf]  ;;  %vm98_vm1 = vcmask 293888   ;;  %vm495_vm2 = vcmp.lt.s32.totalorder %v155_v30, 320  ;;  %s242_s29 = sshll.u32 %s524_s2, 4  ;;  %s459_s2 = smov [#allocation8]   ;;  %s243_s29 = int_to_ptr.hbm [resolvable:$true] %s242_s29 }
  0x13   :  { %143 = vmatpush.bf16.msra.mxu2 %v110_v16  ;;  %v457_v32 = vmov 0.0   ;;  %vm174_vm3 = vcmask 523264   ;;  %vm233_vm4 = vcmask 519168   ;;  %vm187_vm5 = vcmask 1040384   ;;  %s251_s30 = sshll.u32 %s459_s2, 4  ;;  %s253_s7 = sshll.u32 %s525_s3, 4  ;;  %s252_s30 = int_to_ptr.vmem [resolvable:$true] %s251_s30  ;;  %s254_s7 = int_to_ptr.hbm [resolvable:$true] %s253_s7 }
  0x14   :  { %159 = vst.msk [vmem:[#allocation8] sm:$0x7] %vm495_vm2, %v457_v32  ;;  %s460_s8 = smov [#allocation10]   ;;  %s264_s12 = sshll.u32 %s526_s4, 4  ;;  %s265_s12 = int_to_ptr.hbm [resolvable:$true] %s264_s12 }
  0x15   :  { %160 = vst.msk [vmem:[#allocation10] sm:$0x7] %vm495_vm2, %v457_v32  ;;  %s262_s9 = sshll.u32 %s460_s8, 4  ;;  %s263_s9 = int_to_ptr.vmem [resolvable:$true] %s262_s9 }
  0x16   :  { %118 = vmatpush.bf16.msra.mxu0 %v299_v17  ;;  %131 = vmatpush.bf16.msra.mxu1 %v303_v18 }
  0x17   :  { %144 = vmatpush.bf16.msra.mxu2 %v307_v20 }
  0x1a   :  { %119 = vmatpush.bf16.msra.mxu0 %v287_v26  ;;  %132 = vmatpush.bf16.msra.mxu1 %v291_v27 }
  0x1b   :  { %145 = vmatpush.bf16.msra.mxu2 %v295_v28  ;;  %v161_v21 = vld [vmem:[#allocation8] sm:$0x7] }
  0x1c   :  { %v197_v25 = vld [vmem:[#allocation10] sm:$0x7] }
  0x1d   :  { %308 = vmatmul.msk.bf16.vlgmr.msra.gmra.mxu0 %vm98_vm1, %v47_v29  ;;  %309 = vmatmul.msk.bf16.vlgmr.msra.gmra.mxu1 %vm98_vm1, %v47_v29 }
  0x1e   :  { %310 = vmatmul.msk.bf16.vlgmr.msra.gmra.mxu2 %vm98_vm1, %v47_v29 }
  0x9a   :  { %v121_v33 = vpop.f32.mrf.mxu0  ;;  %v134_v34 = vpop.f32.mrf.mxu1 }
  0x9b   :  { %v162_v35 = vrot.slane %v121_v33, 4  ;;  %v198_v36 = vmul.f32 %v121_v33, %v121_v33  ;;  %v168_v37 = vrot.slane %v134_v34, 4  ;;  %v199_v38 = vmul.f32 %v134_v34, %v134_v34 }
  0x9c   :  { %v230_v39 = vpack.c.bf16 %v134_v34, %v121_v33 }
  0x9d   :  { %v163_v40 = vadd.f32 %v162_v35, %v121_v33  ;;  %v201_v41 = vrot.slane %v198_v36, 4  ;;  %v169_v42 = vadd.f32 %v168_v37, %v134_v34  ;;  %v207_v43 = vrot.slane %v199_v38, 4 }
  0x9e   :  { %232 = vst [vmem:[#allocation7] sm:$0xff] %v230_v39 }
  0x9f   :  { %v202_v44 = vadd.f32 %v201_v41, %v198_v36  ;;  %v170_v45 = vrot.slane %v169_v42, 2  ;;  %v208_v46 = vadd.f32 %v207_v43, %v199_v38  ;;  %v164_v47 = vrot.slane %v163_v40, 2 }
  0xa1   :  { %v171_v48 = vadd.f32 %v170_v45, %v169_v42  ;;  %v209_v49 = vrot.slane %v208_v46, 2  ;;  %v147_v50 = vpop.f32.mrf.mxu2  ;;  %v203_v56 = vrot.slane %v202_v44, 2  ;;  %v165_v60 = vadd.f32 %v164_v47, %v163_v40 }
  0xa2   :  { %v175_v51 = vsel %vm174_vm3, %v147_v50, 0.0  ;;  %v200_v52 = vmul.f32 %v147_v50, %v147_v50  ;;  %v231_v53 = vpack.c.bf16 %v147_v50, %v147_v50  ;;  %v123_v54 = vpop.f32.mrf.mxu0  ;;  %v136_v55 = vpop.f32.mrf.mxu1 }
  0xa3   :  { %v210_v57 = vadd.f32 %v209_v49, %v208_v46  ;;  %v176_v58 = vrot.slane %v175_v51, 4  ;;  %v172_v61 = vrot.slane %v171_v48, 1  ;;  %v204_v0 = vadd.f32 %v203_v56, %v202_v44 }
  0xa4   :  { %v213_v59 = vsel %vm174_vm3, %v200_v52, 0.0  ;;  %234 = vst.msk [vmem:[#allocation7 + $0x8] sm:$0xf] %vm233_vm4, %v231_v53  ;;  %v166_v4 = vrot.slane %v165_v60, 1 }
  0xa5   :  { %245 = dma.vmem_to_hbm [thread:$0]  %s241_s1, 192, %s243_s29, [#allocation4]   ;;  %v177_v62 = vadd.f32 %v176_v58, %v175_v51  ;;  %v214_v63 = vrot.slane %v213_v59, 4  ;;  %v211_v1 = vrot.slane %v210_v57, 1  ;;  %v173_v5 = vadd.f32 %v172_v61, %v171_v48 }
  0xa6   :  { %v205_v9 = vrot.slane %v204_v0, 1  ;;  %v167_v13 = vadd.f32 %v166_v4, %v165_v60 }
  0xa7   :  { %v178_v2 = vrot.slane %v177_v62, 2  ;;  %v215_v3 = vadd.f32 %v214_v63, %v213_v59  ;;  %v212_v10 = vadd.f32 %v211_v1, %v210_v57  ;;  %v185_v14 = vrot.slane %v173_v5, 7 }
  0xa8   :  { %v206_v17 = vadd.f32 %v205_v9, %v204_v0 }
  0xa9   :  { %v149_v6 = vpop.f32.mrf.mxu2  ;;  %v179_v7 = vadd.f32 %v178_v2, %v177_v62  ;;  %v216_v8 = vrot.slane %v215_v3, 2  ;;  %v223_v18 = vrot.slane %v212_v10, 7  ;;  %v188_v22 = vsel %vm187_vm5, %v167_v13, %v185_v14 }
  0xab   :  { %v180_v11 = vrot.slane %v179_v7, 1  ;;  %v217_v12 = vadd.f32 %v216_v8, %v215_v3  ;;  %v225_v27 = vsel %vm187_vm5, %v206_v17, %v223_v18 }
  0xad   :  { %v181_v15 = vadd.f32 %v180_v11, %v179_v7  ;;  %v218_v16 = vrot.slane %v217_v12, 1 }
  0xaf   :  { %v186_v19 = vrot.slane %v181_v15, 6  ;;  %v219_v20 = vadd.f32 %v218_v16, %v217_v12 }
  0xb1   :  { %v224_v23 = vrot.slane %v219_v20, 6  ;;  %v189_v24 = vsel %vm102_vm0, %v188_v22, %v186_v19 }
  0xb2   :  { %v191_v26 = vadd.f32 %v189_v24, %v161_v21 }
  0xb3   :  { %v226_v28 = vsel %vm102_vm0, %v225_v27, %v224_v23 }
  0xb4   :  { %196 = vst.msk [vmem:[#allocation8] sm:$0x7] %vm495_vm2, %v191_v26  ;;  %v228_v29 = vadd.f32 %v226_v28, %v197_v25 }
  0xb5   :  { %256 = dma.vmem_to_hbm [thread:$0]  %s252_s30, 48, %s254_s7, [#allocation9]  }
  0xb6   :  { %229 = vst.msk [vmem:[#allocation10] sm:$0x7] %vm495_vm2, %v228_v29 }
  0xb7   :  { %267 = dma.vmem_to_hbm [thread:$0]  %s263_s9, 48, %s265_s12, [#allocation9]  }
  0xb8   :  { %449 = dma.done.wait [#allocation4], 192  }
  0xb9   :  { %450 = vsyncadd [#allocation4], 4294967104 }
  0xba   :  { %451 = dma.done.wait [#allocation9], 96  }
  0xbb   :  { %452 = vsyncadd [#allocation9], 4294967200 }
  0xbc   :  { %280 = vsyncpa [#allocation3], 1 }
  0xbd   :  { %281 = vsyncpa [#allocation6], 1 }
  0xbe   :  { %282 = vsyncpa [#allocation4], 1 }
  0xbf   :  { %283 = vsyncpa [#allocation9], 1 }

</bundles_post_ra>
